<compile_context>
chip_gen: v6e
topology: v6e:2x2x1
jax: 0.10.0
libtpu: 0.0.40
codegen_flags: <defaults>
</compile_context>

<pallas_src>
import functools
import math

import jax
import jax.numpy as jnp
from jax import lax
from jax.experimental import pallas as pl
from jax.experimental.pallas import tpu as pltpu

NEG_SLOPE = 0.01   # torch.nn.LeakyReLU default
LANE = 128
SUBLANE = 8
VMEM_BUDGET = 20 * 1024 * 1024   # activation budget per tile (leave pipeline headroom)


def _round_up(x, m):
    return ((x + m - 1) // m) * m


# ----------------------------------------------------------------------------
# Fused kernel: h-scaling + in-VMEM pair gather + PairNet MLP + bridge flip + concat
# ----------------------------------------------------------------------------
def _fused_generator_kernel(bm_ref, noise_ref, r_ref,
                            w1_ref, b1_ref, w2_ref, b2_ref, w3_ref, b3_ref,
                            o_ref, *, noise_size, bm_dim, pairs):
    ns = noise_size
    tb = bm_ref.shape[0]

    # sqrt(1/12) scaling of the H columns (column 0 of each noise block), done
    # in-kernel so the scaled noise never round-trips through HBM.
    noise = noise_ref[...]                                            # (tb, ns*bm_dim) f32
    col = lax.broadcasted_iota(jnp.int32, noise.shape, 1)
    h_scale = jnp.where((col % ns) == 0,
                        jnp.float32(math.sqrt(1.0 / 12.0)), jnp.float32(1.0))
    noise = noise * h_scale

    # Pair gather in VMEM (static pair table), stacked pair-major along the
    # sublane axis so a single MXU pass covers every (pair, batch-row) of the tile.
    xs = [jnp.concatenate([noise[:, i * ns:(i + 1) * ns],
                           noise[:, j * ns:(j + 1) * ns]], axis=1)
          for (i, j) in pairs]
    x = jnp.concatenate(xs, axis=0).astype(jnp.bfloat16)              # (levy_dim*tb, 2*ns)

    # PairNet MLP: bf16 MXU inputs, f32 accumulation, f32 bias/LeakyReLU epilogue.
    h1 = jnp.dot(x, w1_ref[...], preferred_element_type=jnp.float32) + b1_ref[...]
    h1 = jnp.where(h1 > 0, h1, NEG_SLOPE * h1)
    h2 = jnp.dot(h1.astype(jnp.bfloat16), w2_ref[...],
                 preferred_element_type=jnp.float32) + b2_ref[...]
    h2 = jnp.where(h2 > 0, h2, NEG_SLOPE * h2)
    b_all = jnp.dot(h2.astype(jnp.bfloat16), w3_ref[...],
                    preferred_element_type=jnp.float32) + b3_ref[...]  # (levy_dim*tb, 1)

    # Bridge flipping + last-rademacher scaling + concat (pure VPU, all in-VMEM).
    bm = bm_ref[...]                                                   # (tb, bm_dim)
    r = r_ref[...]                                                     # (tb, bm_dim+1)
    last_r = r[:, bm_dim:bm_dim + 1]                                   # (tb, 1)

    levy_cols = []
    for p, (i, j) in enumerate(pairs):
        w_i = bm[:, i:i + 1]
        w_j = bm[:, j:j + 1]
        h_i = noise[:, i * ns:i * ns + 1]
        h_j = noise[:, j * ns:j * ns + 1]
        r_i = r[:, i:i + 1]
        r_j = r[:, j:j + 1]
        b_p = b_all[p * tb:(p + 1) * tb, :]                            # (tb, 1)
        levy = r_i * h_i * w_j - r_j * h_j * w_i + r_i * r_j * b_p
        levy_cols.append(last_r * levy)

    o_ref[...] = jnp.concatenate([bm] + levy_cols, axis=1)             # (tb, bm_dim+levy_dim)


# ----------------------------------------------------------------------------
# Parameter init / padding, latent sampling, forward wrapper
# ----------------------------------------------------------------------------
def init_pairnet_params(key, noise_size, hidden):
    """Deterministic PyTorch-Linear-style init (uniform +/- 1/sqrt(fan_in)), f32."""
    k = jax.random.split(key, 6)
    d_in = 2 * noise_size

    def lin(kw, kb, fan_in, fan_out):
        bound = 1.0 / math.sqrt(fan_in)
        w = jax.random.uniform(kw, (fan_in, fan_out), jnp.float32, -bound, bound)
        b = jax.random.uniform(kb, (1, fan_out), jnp.float32, -bound, bound)
        return w, b

    w1, b1 = lin(k[0], k[1], d_in, hidden)
    w2, b2 = lin(k[2], k[3], hidden, hidden)
    w3, b3 = lin(k[4], k[5], hidden, 1)
    return (w1, b1, w2, b2, w3, b3)


def _pad_and_cast_params(params, hidden_padded):
    """Zero-pad hidden width to `hidden_padded` (exactly preserves the MLP output:
    padded units are 0 and LeakyReLU(0)=0) and cast weight matrices to bf16 for the MXU."""
    w1, b1, w2, b2, w3, b3 = params
    d_in, h = w1.shape
    hp = hidden_padded
    w1p = jnp.zeros((d_in, hp), jnp.float32).at[:, :h].set(w1).astype(jnp.bfloat16)
    b1p = jnp.zeros((1, hp), jnp.float32).at[:, :h].set(b1)
    w2p = jnp.zeros((hp, hp), jnp.float32).at[:h, :h].set(w2).astype(jnp.bfloat16)
    b2p = jnp.zeros((1, hp), jnp.float32).at[:, :h].set(b2)
    w3p = jnp.zeros((hp, 1), jnp.float32).at[:h, :].set(w3).astype(jnp.bfloat16)
    b3p = b3.astype(jnp.float32)
    return w1p, b1p, w2p, b2p, w3p, b3p


def sample_generator_randomness(key, bsz, bm_dim, noise_size):
    """get_latent_vector (noise_types == []) + rademacher signs, in plain JAX."""
    k_noise, k_rad = jax.random.split(key)
    noise = jax.random.normal(k_noise, (bsz, noise_size * bm_dim), dtype=jnp.float32)
    r = 2.0 * (jax.random.bernoulli(k_rad, 0.5, (bsz, bm_dim + 1)).astype(jnp.float32) - 0.5)
    return noise, r


def _pick_row_tile(bsz, bm_dim, noise_size, hp, tb_max):
    """Largest row tile (multiple of 8, <= tb_max) whose pair-stacked activations
    fit the VMEM budget; never larger than the (8-rounded) batch."""
    levy_dim = bm_dim * (bm_dim - 1) // 2
    # dominant per-batch-row bytes: x (bf16) + h1,h2 (f32) + b (f32), all x levy_dim rows
    per_row = levy_dim * (2 * noise_size * 2 + 2 * hp * 4 + 4) + 4 * noise_size * bm_dim
    tb = max(SUBLANE, (VMEM_BUDGET // max(per_row, 1)) // SUBLANE * SUBLANE)
    tb = min(tb, tb_max, _round_up(bsz, SUBLANE))
    return max(SUBLANE, tb)


def pairnet_generator_forward(bm, params, noise, r, *, noise_size, tb=256):
    bm = jnp.asarray(bm, jnp.float32)
    bsz, bm_dim = bm.shape
    levy_dim = bm_dim * (bm_dim - 1) // 2
    pairs = tuple((i, j) for i in range(bm_dim) for j in range(i + 1, bm_dim))

    hidden = params[0].shape[1]
    hp = _round_up(max(hidden, LANE), LANE)
    w1, b1, w2, b2, w3, b3 = _pad_and_cast_params(params, hp)

    # Batch tiling: largest VMEM-safe tile <= tb, batch padded up to a multiple of it.
    tb_eff = _pick_row_tile(bsz, bm_dim, noise_size, hp, tb)
    bsz_p = _round_up(bsz, tb_eff)
    if bsz_p != bsz:
        pad = bsz_p - bsz
        bm_p = jnp.pad(bm, ((0, pad), (0, 0)))
        noise_p = jnp.pad(noise, ((0, pad), (0, 0)))
        r_p = jnp.pad(r, ((0, pad), (0, 0)))
    else:
        bm_p, noise_p, r_p = bm, noise, r

    kernel = functools.partial(_fused_generator_kernel,
                               noise_size=noise_size, bm_dim=bm_dim, pairs=pairs)

    out = pl.pallas_call(
        kernel,
        out_shape=jax.ShapeDtypeStruct((bsz_p, bm_dim + levy_dim), jnp.float32),
        grid=(bsz_p // tb_eff,),
        in_specs=[
            pl.BlockSpec((tb_eff, bm_dim), lambda t: (t, 0)),                # bm tile
            pl.BlockSpec((tb_eff, noise_size * bm_dim), lambda t: (t, 0)),   # noise tile
            pl.BlockSpec((tb_eff, bm_dim + 1), lambda t: (t, 0)),            # rademacher tile
            pl.BlockSpec((2 * noise_size, hp), lambda t: (0, 0)),            # W1 (resident)
            pl.BlockSpec((1, hp), lambda t: (0, 0)),                         # b1
            pl.BlockSpec((hp, hp), lambda t: (0, 0)),                        # W2 (resident)
            pl.BlockSpec((1, hp), lambda t: (0, 0)),                         # b2
            pl.BlockSpec((hp, 1), lambda t: (0, 0)),                         # W3 (resident)
            pl.BlockSpec((1, 1), lambda t: (0, 0)),                          # b3
        ],
        out_specs=pl.BlockSpec((tb_eff, bm_dim + levy_dim), lambda t: (t, 0)),
        compiler_params=pltpu.CompilerParams(
            dimension_semantics=("parallel",),
            vmem_limit_bytes=64 * 1024 * 1024),
    )(bm_p, noise_p, r_p, w1, b1, w2, b2, w3, b3)

    return out[:bsz]


# ----------------------------------------------------------------------------
# Pure-JAX f32 reference (mirrors the original torch forward) for a tolerance check
# ----------------------------------------------------------------------------
def reference_forward(bm, params, noise, r, *, noise_size):
    bsz, bm_dim = bm.shape
    levy_dim = bm_dim * (bm_dim - 1) // 2
    iu, ju = jnp.triu_indices(bm_dim, k=1)
    h_idx = noise_size * jnp.arange(bm_dim)

    noise = noise.at[:, h_idx].multiply(jnp.float32(math.sqrt(1.0 / 12.0)))
    h = noise[:, h_idx]
    triu = jnp.stack([iu, ju], axis=1)
    levy_idx = (noise_size * triu[:, :, None]
                + jnp.arange(noise_size)[None, None, :]).reshape(levy_dim, 2 * noise_size)
    x = noise[:, levy_idx].reshape(bsz * levy_dim, 2 * noise_size)

    w1, b1, w2, b2, w3, b3 = params
    lrelu = lambda v: jnp.where(v > 0, v, NEG_SLOPE * v)
    h1 = lrelu(x @ w1 + b1)
    h2 = lrelu(h1 @ w2 + b2)
    b = (h2 @ w3 + b3).reshape(bsz, levy_dim)

    r_flip, last_r = r[:, :bm_dim], r[:, bm_dim:]
    w_i, w_j = bm[:, iu], bm[:, ju]
    h_i, h_j = h[:, iu], h[:, ju]
    r_i, r_j = r_flip[:, iu], r_flip[:, ju]
    levy = last_r * (r_i * h_i * w_j - r_j * h_j * w_i + r_i * r_j * b)
    return jnp.concatenate([bm, levy], axis=1)


if __name__ == "__main__":
    # small shapes consistent with the module: bm_dim=4 -> levy_dim=6, noise_size=8
    bsz, bm_dim, noise_size, hidden = 8, 4, 8, 32
    levy_dim = bm_dim * (bm_dim - 1) // 2

    key = jax.random.PRNGKey(0)
    k_param, k_bm, k_fwd = jax.random.split(key, 3)

    params = init_pairnet_params(k_param, noise_size, hidden)
    bm = jax.random.normal(k_bm, (bsz, bm_dim), dtype=jnp.float32)   # Brownian increment
    noise, r = sample_generator_randomness(k_fwd, bsz, bm_dim, noise_size)

    out = pairnet_generator_forward(bm, params, noise, r, noise_size=noise_size)
    out = jax.block_until_ready(out)

    assert out.shape == (bsz, bm_dim + levy_dim), out.shape
    assert out.dtype == jnp.float32
    assert bool(jnp.all(jnp.isfinite(out)))
    # first bm_dim columns must be the input BM (cat semantics)
    assert bool(jnp.allclose(out[:, :bm_dim], bm))
    # full forward vs f32 reference (bf16 MXU inputs -> loose tolerance)
    ref = reference_forward(bm, params, noise, r, noise_size=noise_size)
    assert bool(jnp.allclose(out, ref, rtol=1e-2, atol=5e-2)), (
        float(jnp.max(jnp.abs(out - ref))))

    print("KERNEL_OK")
</pallas_src>

<mosaic_0001>
module attributes {stable_mosaic.version = 11 : i64} {
  func.func @_fused_generator_kernel(%arg0: i32, %arg1: memref<8x4xf32, #tpu.memory_space<vmem>>, %arg2: memref<8x32xf32, #tpu.memory_space<vmem>>, %arg3: memref<8x5xf32, #tpu.memory_space<vmem>>, %arg4: memref<16x128xbf16, #tpu.memory_space<vmem>>, %arg5: memref<1x128xf32, #tpu.memory_space<vmem>>, %arg6: memref<128x128xbf16, #tpu.memory_space<vmem>>, %arg7: memref<1x128xf32, #tpu.memory_space<vmem>>, %arg8: memref<128x1xbf16, #tpu.memory_space<vmem>>, %arg9: memref<1x1xf32, #tpu.memory_space<vmem>>, %arg10: memref<8x10xf32, #tpu.memory_space<vmem>>) attributes {dimension_semantics = [#tpu.dimension_semantics<parallel>], iteration_bounds = array<i64: 1>, scalar_prefetch = 0 : i64, scratch_operands = 0 : i64, tpu.core_type = #tpu.core_type<tc>, window_params = [{transform_indices = @transform_0, window_bounds = array<i64: 8, 4>}, {transform_indices = @transform_1, window_bounds = array<i64: 8, 32>}, {transform_indices = @transform_2, window_bounds = array<i64: 8, 5>}, {pipeline_mode = #tpu.pipeline_mode<synchronous>, transform_indices = @transform_3, window_bounds = array<i64: 16, 128>}, {pipeline_mode = #tpu.pipeline_mode<synchronous>, transform_indices = @transform_4, window_bounds = array<i64: 1, 128>}, {pipeline_mode = #tpu.pipeline_mode<synchronous>, transform_indices = @transform_5, window_bounds = array<i64: 128, 128>}, {pipeline_mode = #tpu.pipeline_mode<synchronous>, transform_indices = @transform_6, window_bounds = array<i64: 1, 128>}, {pipeline_mode = #tpu.pipeline_mode<synchronous>, transform_indices = @transform_7, window_bounds = array<i64: 128, 1>}, {pipeline_mode = #tpu.pipeline_mode<synchronous>, transform_indices = @transform_8, window_bounds = array<i64: 1, 1>}, {transform_indices = @transform_9, window_bounds = array<i64: 8, 10>}]} {
    %c0 = arith.constant 0 : index
    %c0_0 = arith.constant 0 : index
    %0 = vector.load %arg2[%c0, %c0_0] : memref<8x32xf32, #tpu.memory_space<vmem>>, vector<8x32xf32>
    %1 = tpu.iota {dimensions = array<i32: 1>} : vector<8x32xi32>
    %c8_i32 = arith.constant 8 : i32
    %c0_i32 = arith.constant 0 : i32
    %2 = arith.cmpi eq, %c8_i32, %c0_i32 : i32
    %c1_i32 = arith.constant 1 : i32
    %3 = arith.select %2, %c1_i32, %c8_i32 : i32
    %4 = vector.broadcast %3 : i32 to vector<8x32xi32>
    %5 = arith.remsi %1, %4 : vector<8x32xi32>
    %c0_i32_1 = arith.constant 0 : i32
    %6 = vector.broadcast %c0_i32_1 : i32 to vector<8x32xi32>
    %7 = arith.cmpi ne, %5, %6 : vector<8x32xi32>
    %c0_i32_2 = arith.constant 0 : i32
    %8 = vector.broadcast %c0_i32_2 : i32 to vector<8x32xi32>
    %9 = arith.cmpi slt, %5, %8 : vector<8x32xi32>
    %c0_i32_3 = arith.constant 0 : i32
    %10 = arith.cmpi slt, %3, %c0_i32_3 : i32
    %11 = vector.broadcast %10 : i1 to vector<8x32xi1>
    %12 = vector.broadcast %11 : vector<8x32xi1> to vector<8x32xi1>
    %13 = arith.xori %9, %12 : vector<8x32xi1>
    %14 = arith.andi %13, %7 : vector<8x32xi1>
    %15 = vector.broadcast %3 : i32 to vector<8x32xi32>
    %16 = arith.addi %5, %15 : vector<8x32xi32>
    %17 = arith.select %14, %16, %5 : vector<8x32xi1>, vector<8x32xi32>
    %c0_i32_4 = arith.constant 0 : i32
    %18 = vector.broadcast %c0_i32_4 : i32 to vector<8x32xi32>
    %19 = arith.cmpi eq, %17, %18 : vector<8x32xi32>
    %cst = arith.constant 0.288675129 : f32
    %cst_5 = arith.constant 1.000000e+00 : f32
    %20 = vector.broadcast %cst : f32 to vector<8x32xf32>
    %21 = vector.broadcast %cst_5 : f32 to vector<8x32xf32>
    %22 = arith.select %19, %20, %21 : vector<8x32xi1>, vector<8x32xf32>
    %23 = arith.mulf %0, %22 : vector<8x32xf32>
    %24 = vector.extract_strided_slice %23 {offsets = [0, 0], sizes = [8, 8], strides = [1, 1]} : vector<8x32xf32> to vector<8x8xf32>
    %25 = vector.extract_strided_slice %23 {offsets = [0, 8], sizes = [8, 8], strides = [1, 1]} : vector<8x32xf32> to vector<8x8xf32>
    %26 = tpu.concatenate %24, %25 in 1 : vector<8x8xf32>, vector<8x8xf32> -> vector<8x16xf32>
    %27 = vector.extract_strided_slice %23 {offsets = [0, 0], sizes = [8, 8], strides = [1, 1]} : vector<8x32xf32> to vector<8x8xf32>
    %28 = vector.extract_strided_slice %23 {offsets = [0, 16], sizes = [8, 8], strides = [1, 1]} : vector<8x32xf32> to vector<8x8xf32>
    %29 = tpu.concatenate %27, %28 in 1 : vector<8x8xf32>, vector<8x8xf32> -> vector<8x16xf32>
    %30 = vector.extract_strided_slice %23 {offsets = [0, 0], sizes = [8, 8], strides = [1, 1]} : vector<8x32xf32> to vector<8x8xf32>
    %31 = vector.extract_strided_slice %23 {offsets = [0, 24], sizes = [8, 8], strides = [1, 1]} : vector<8x32xf32> to vector<8x8xf32>
    %32 = tpu.concatenate %30, %31 in 1 : vector<8x8xf32>, vector<8x8xf32> -> vector<8x16xf32>
    %33 = vector.extract_strided_slice %23 {offsets = [0, 8], sizes = [8, 8], strides = [1, 1]} : vector<8x32xf32> to vector<8x8xf32>
    %34 = vector.extract_strided_slice %23 {offsets = [0, 16], sizes = [8, 8], strides = [1, 1]} : vector<8x32xf32> to vector<8x8xf32>
    %35 = tpu.concatenate %33, %34 in 1 : vector<8x8xf32>, vector<8x8xf32> -> vector<8x16xf32>
    %36 = vector.extract_strided_slice %23 {offsets = [0, 8], sizes = [8, 8], strides = [1, 1]} : vector<8x32xf32> to vector<8x8xf32>
    %37 = vector.extract_strided_slice %23 {offsets = [0, 24], sizes = [8, 8], strides = [1, 1]} : vector<8x32xf32> to vector<8x8xf32>
    %38 = tpu.concatenate %36, %37 in 1 : vector<8x8xf32>, vector<8x8xf32> -> vector<8x16xf32>
    %39 = vector.extract_strided_slice %23 {offsets = [0, 16], sizes = [8, 8], strides = [1, 1]} : vector<8x32xf32> to vector<8x8xf32>
    %40 = vector.extract_strided_slice %23 {offsets = [0, 24], sizes = [8, 8], strides = [1, 1]} : vector<8x32xf32> to vector<8x8xf32>
    %41 = tpu.concatenate %39, %40 in 1 : vector<8x8xf32>, vector<8x8xf32> -> vector<8x16xf32>
    %42 = tpu.concatenate %26, %29, %32, %35, %38, %41 in 0 : vector<8x16xf32>, vector<8x16xf32>, vector<8x16xf32>, vector<8x16xf32>, vector<8x16xf32>, vector<8x16xf32> -> vector<48x16xf32>
    %43 = arith.truncf %42 : vector<48x16xf32> to vector<48x16xbf16>
    %c0_6 = arith.constant 0 : index
    %c0_7 = arith.constant 0 : index
    %44 = vector.load %arg4[%c0_6, %c0_7] : memref<16x128xbf16, #tpu.memory_space<vmem>>, vector<16x128xbf16>
    %cst_8 = arith.constant dense<0.000000e+00> : vector<48x128xf32>
    %45 = tpu.matmul %43, %44, %cst_8 {dimension_numbers = #tpu.dot_dimension_numbers<[1], [0], [0], [1], [0, 0, 1, 1], [], []>} : vector<48x16xbf16>, vector<16x128xbf16>, vector<48x128xf32> -> vector<48x128xf32>
    %c0_9 = arith.constant 0 : index
    %c0_10 = arith.constant 0 : index
    %46 = vector.load %arg5[%c0_9, %c0_10] : memref<1x128xf32, #tpu.memory_space<vmem>>, vector<1x128xf32>
    %47 = vector.broadcast %46 : vector<1x128xf32> to vector<48x128xf32>
    %48 = arith.addf %45, %47 : vector<48x128xf32>
    %cst_11 = arith.constant 0.000000e+00 : f32
    %49 = vector.broadcast %cst_11 : f32 to vector<48x128xf32>
    %50 = arith.cmpf ogt, %48, %49 : vector<48x128xf32>
    %cst_12 = arith.constant 0.00999999977 : f32
    %51 = vector.broadcast %cst_12 : f32 to vector<48x128xf32>
    %52 = arith.mulf %51, %48 : vector<48x128xf32>
    %53 = arith.select %50, %48, %52 : vector<48x128xi1>, vector<48x128xf32>
    %54 = arith.truncf %53 : vector<48x128xf32> to vector<48x128xbf16>
    %c0_13 = arith.constant 0 : index
    %c0_14 = arith.constant 0 : index
    %55 = vector.load %arg6[%c0_13, %c0_14] : memref<128x128xbf16, #tpu.memory_space<vmem>>, vector<128x128xbf16>
    %cst_15 = arith.constant dense<0.000000e+00> : vector<48x128xf32>
    %56 = tpu.matmul %54, %55, %cst_15 {dimension_numbers = #tpu.dot_dimension_numbers<[1], [0], [0], [1], [0, 0, 1, 1], [], []>} : vector<48x128xbf16>, vector<128x128xbf16>, vector<48x128xf32> -> vector<48x128xf32>
    %c0_16 = arith.constant 0 : index
    %c0_17 = arith.constant 0 : index
    %57 = vector.load %arg7[%c0_16, %c0_17] : memref<1x128xf32, #tpu.memory_space<vmem>>, vector<1x128xf32>
    %58 = vector.broadcast %57 : vector<1x128xf32> to vector<48x128xf32>
    %59 = arith.addf %56, %58 : vector<48x128xf32>
    %cst_18 = arith.constant 0.000000e+00 : f32
    %60 = vector.broadcast %cst_18 : f32 to vector<48x128xf32>
    %61 = arith.cmpf ogt, %59, %60 : vector<48x128xf32>
    %cst_19 = arith.constant 0.00999999977 : f32
    %62 = vector.broadcast %cst_19 : f32 to vector<48x128xf32>
    %63 = arith.mulf %62, %59 : vector<48x128xf32>
    %64 = arith.select %61, %59, %63 : vector<48x128xi1>, vector<48x128xf32>
    %65 = arith.truncf %64 : vector<48x128xf32> to vector<48x128xbf16>
    %c0_20 = arith.constant 0 : index
    %c0_21 = arith.constant 0 : index
    %66 = vector.load %arg8[%c0_20, %c0_21] : memref<128x1xbf16, #tpu.memory_space<vmem>>, vector<128x1xbf16>
    %cst_22 = arith.constant dense<0.000000e+00> : vector<48x1xf32>
    %67 = tpu.matmul %65, %66, %cst_22 {dimension_numbers = #tpu.dot_dimension_numbers<[1], [0], [0], [1], [0, 0, 1, 1], [], []>} : vector<48x128xbf16>, vector<128x1xbf16>, vector<48x1xf32> -> vector<48x1xf32>
    %c0_23 = arith.constant 0 : index
    %c0_24 = arith.constant 0 : index
    %68 = vector.load %arg9[%c0_23, %c0_24] : memref<1x1xf32, #tpu.memory_space<vmem>>, vector<1x1xf32>
    %69 = vector.broadcast %68 : vector<1x1xf32> to vector<48x1xf32>
    %70 = arith.addf %67, %69 : vector<48x1xf32>
    %c0_25 = arith.constant 0 : index
    %c0_26 = arith.constant 0 : index
    %71 = vector.load %arg1[%c0_25, %c0_26] : memref<8x4xf32, #tpu.memory_space<vmem>>, vector<8x4xf32>
    %c0_27 = arith.constant 0 : index
    %c0_28 = arith.constant 0 : index
    %72 = vector.load %arg3[%c0_27, %c0_28] : memref<8x5xf32, #tpu.memory_space<vmem>>, vector<8x5xf32>
    %73 = vector.extract_strided_slice %72 {offsets = [0, 4], sizes = [8, 1], strides = [1, 1]} : vector<8x5xf32> to vector<8x1xf32>
    %74 = vector.extract_strided_slice %71 {offsets = [0, 0], sizes = [8, 1], strides = [1, 1]} : vector<8x4xf32> to vector<8x1xf32>
    %75 = vector.extract_strided_slice %71 {offsets = [0, 1], sizes = [8, 1], strides = [1, 1]} : vector<8x4xf32> to vector<8x1xf32>
    %76 = vector.extract_strided_slice %23 {offsets = [0, 0], sizes = [8, 1], strides = [1, 1]} : vector<8x32xf32> to vector<8x1xf32>
    %77 = vector.extract_strided_slice %23 {offsets = [0, 8], sizes = [8, 1], strides = [1, 1]} : vector<8x32xf32> to vector<8x1xf32>
    %78 = vector.extract_strided_slice %72 {offsets = [0, 0], sizes = [8, 1], strides = [1, 1]} : vector<8x5xf32> to vector<8x1xf32>
    %79 = vector.extract_strided_slice %72 {offsets = [0, 1], sizes = [8, 1], strides = [1, 1]} : vector<8x5xf32> to vector<8x1xf32>
    %80 = vector.extract_strided_slice %70 {offsets = [0, 0], sizes = [8, 1], strides = [1, 1]} : vector<48x1xf32> to vector<8x1xf32>
    %81 = arith.mulf %78, %76 : vector<8x1xf32>
    %82 = arith.mulf %81, %75 : vector<8x1xf32>
    %83 = arith.mulf %79, %77 : vector<8x1xf32>
    %84 = arith.mulf %83, %74 : vector<8x1xf32>
    %85 = arith.subf %82, %84 : vector<8x1xf32>
    %86 = arith.mulf %78, %79 : vector<8x1xf32>
    %87 = arith.mulf %86, %80 : vector<8x1xf32>
    %88 = arith.addf %85, %87 : vector<8x1xf32>
    %89 = arith.mulf %73, %88 : vector<8x1xf32>
    %90 = vector.extract_strided_slice %71 {offsets = [0, 0], sizes = [8, 1], strides = [1, 1]} : vector<8x4xf32> to vector<8x1xf32>
    %91 = vector.extract_strided_slice %71 {offsets = [0, 2], sizes = [8, 1], strides = [1, 1]} : vector<8x4xf32> to vector<8x1xf32>
    %92 = vector.extract_strided_slice %23 {offsets = [0, 0], sizes = [8, 1], strides = [1, 1]} : vector<8x32xf32> to vector<8x1xf32>
    %93 = vector.extract_strided_slice %23 {offsets = [0, 16], sizes = [8, 1], strides = [1, 1]} : vector<8x32xf32> to vector<8x1xf32>
    %94 = vector.extract_strided_slice %72 {offsets = [0, 0], sizes = [8, 1], strides = [1, 1]} : vector<8x5xf32> to vector<8x1xf32>
    %95 = vector.extract_strided_slice %72 {offsets = [0, 2], sizes = [8, 1], strides = [1, 1]} : vector<8x5xf32> to vector<8x1xf32>
    %96 = vector.extract_strided_slice %70 {offsets = [8, 0], sizes = [8, 1], strides = [1, 1]} : vector<48x1xf32> to vector<8x1xf32>
    %97 = arith.mulf %94, %92 : vector<8x1xf32>
    %98 = arith.mulf %97, %91 : vector<8x1xf32>
    %99 = arith.mulf %95, %93 : vector<8x1xf32>
    %100 = arith.mulf %99, %90 : vector<8x1xf32>
    %101 = arith.subf %98, %100 : vector<8x1xf32>
    %102 = arith.mulf %94, %95 : vector<8x1xf32>
    %103 = arith.mulf %102, %96 : vector<8x1xf32>
    %104 = arith.addf %101, %103 : vector<8x1xf32>
    %105 = arith.mulf %73, %104 : vector<8x1xf32>
    %106 = vector.extract_strided_slice %71 {offsets = [0, 0], sizes = [8, 1], strides = [1, 1]} : vector<8x4xf32> to vector<8x1xf32>
    %107 = vector.extract_strided_slice %71 {offsets = [0, 3], sizes = [8, 1], strides = [1, 1]} : vector<8x4xf32> to vector<8x1xf32>
    %108 = vector.extract_strided_slice %23 {offsets = [0, 0], sizes = [8, 1], strides = [1, 1]} : vector<8x32xf32> to vector<8x1xf32>
    %109 = vector.extract_strided_slice %23 {offsets = [0, 24], sizes = [8, 1], strides = [1, 1]} : vector<8x32xf32> to vector<8x1xf32>
    %110 = vector.extract_strided_slice %72 {offsets = [0, 0], sizes = [8, 1], strides = [1, 1]} : vector<8x5xf32> to vector<8x1xf32>
    %111 = vector.extract_strided_slice %72 {offsets = [0, 3], sizes = [8, 1], strides = [1, 1]} : vector<8x5xf32> to vector<8x1xf32>
    %112 = vector.extract_strided_slice %70 {offsets = [16, 0], sizes = [8, 1], strides = [1, 1]} : vector<48x1xf32> to vector<8x1xf32>
    %113 = arith.mulf %110, %108 : vector<8x1xf32>
    %114 = arith.mulf %113, %107 : vector<8x1xf32>
    %115 = arith.mulf %111, %109 : vector<8x1xf32>
    %116 = arith.mulf %115, %106 : vector<8x1xf32>
    %117 = arith.subf %114, %116 : vector<8x1xf32>
    %118 = arith.mulf %110, %111 : vector<8x1xf32>
    %119 = arith.mulf %118, %112 : vector<8x1xf32>
    %120 = arith.addf %117, %119 : vector<8x1xf32>
    %121 = arith.mulf %73, %120 : vector<8x1xf32>
    %122 = vector.extract_strided_slice %71 {offsets = [0, 1], sizes = [8, 1], strides = [1, 1]} : vector<8x4xf32> to vector<8x1xf32>
    %123 = vector.extract_strided_slice %71 {offsets = [0, 2], sizes = [8, 1], strides = [1, 1]} : vector<8x4xf32> to vector<8x1xf32>
    %124 = vector.extract_strided_slice %23 {offsets = [0, 8], sizes = [8, 1], strides = [1, 1]} : vector<8x32xf32> to vector<8x1xf32>
    %125 = vector.extract_strided_slice %23 {offsets = [0, 16], sizes = [8, 1], strides = [1, 1]} : vector<8x32xf32> to vector<8x1xf32>
    %126 = vector.extract_strided_slice %72 {offsets = [0, 1], sizes = [8, 1], strides = [1, 1]} : vector<8x5xf32> to vector<8x1xf32>
    %127 = vector.extract_strided_slice %72 {offsets = [0, 2], sizes = [8, 1], strides = [1, 1]} : vector<8x5xf32> to vector<8x1xf32>
    %128 = vector.extract_strided_slice %70 {offsets = [24, 0], sizes = [8, 1], strides = [1, 1]} : vector<48x1xf32> to vector<8x1xf32>
    %129 = arith.mulf %126, %124 : vector<8x1xf32>
    %130 = arith.mulf %129, %123 : vector<8x1xf32>
    %131 = arith.mulf %127, %125 : vector<8x1xf32>
    %132 = arith.mulf %131, %122 : vector<8x1xf32>
    %133 = arith.subf %130, %132 : vector<8x1xf32>
    %134 = arith.mulf %126, %127 : vector<8x1xf32>
    %135 = arith.mulf %134, %128 : vector<8x1xf32>
    %136 = arith.addf %133, %135 : vector<8x1xf32>
    %137 = arith.mulf %73, %136 : vector<8x1xf32>
    %138 = vector.extract_strided_slice %71 {offsets = [0, 1], sizes = [8, 1], strides = [1, 1]} : vector<8x4xf32> to vector<8x1xf32>
    %139 = vector.extract_strided_slice %71 {offsets = [0, 3], sizes = [8, 1], strides = [1, 1]} : vector<8x4xf32> to vector<8x1xf32>
    %140 = vector.extract_strided_slice %23 {offsets = [0, 8], sizes = [8, 1], strides = [1, 1]} : vector<8x32xf32> to vector<8x1xf32>
    %141 = vector.extract_strided_slice %23 {offsets = [0, 24], sizes = [8, 1], strides = [1, 1]} : vector<8x32xf32> to vector<8x1xf32>
    %142 = vector.extract_strided_slice %72 {offsets = [0, 1], sizes = [8, 1], strides = [1, 1]} : vector<8x5xf32> to vector<8x1xf32>
    %143 = vector.extract_strided_slice %72 {offsets = [0, 3], sizes = [8, 1], strides = [1, 1]} : vector<8x5xf32> to vector<8x1xf32>
    %144 = vector.extract_strided_slice %70 {offsets = [32, 0], sizes = [8, 1], strides = [1, 1]} : vector<48x1xf32> to vector<8x1xf32>
    %145 = arith.mulf %142, %140 : vector<8x1xf32>
    %146 = arith.mulf %145, %139 : vector<8x1xf32>
    %147 = arith.mulf %143, %141 : vector<8x1xf32>
    %148 = arith.mulf %147, %138 : vector<8x1xf32>
    %149 = arith.subf %146, %148 : vector<8x1xf32>
    %150 = arith.mulf %142, %143 : vector<8x1xf32>
    %151 = arith.mulf %150, %144 : vector<8x1xf32>
    %152 = arith.addf %149, %151 : vector<8x1xf32>
    %153 = arith.mulf %73, %152 : vector<8x1xf32>
    %154 = vector.extract_strided_slice %71 {offsets = [0, 2], sizes = [8, 1], strides = [1, 1]} : vector<8x4xf32> to vector<8x1xf32>
    %155 = vector.extract_strided_slice %71 {offsets = [0, 3], sizes = [8, 1], strides = [1, 1]} : vector<8x4xf32> to vector<8x1xf32>
    %156 = vector.extract_strided_slice %23 {offsets = [0, 16], sizes = [8, 1], strides = [1, 1]} : vector<8x32xf32> to vector<8x1xf32>
    %157 = vector.extract_strided_slice %23 {offsets = [0, 24], sizes = [8, 1], strides = [1, 1]} : vector<8x32xf32> to vector<8x1xf32>
    %158 = vector.extract_strided_slice %72 {offsets = [0, 2], sizes = [8, 1], strides = [1, 1]} : vector<8x5xf32> to vector<8x1xf32>
    %159 = vector.extract_strided_slice %72 {offsets = [0, 3], sizes = [8, 1], strides = [1, 1]} : vector<8x5xf32> to vector<8x1xf32>
    %160 = vector.extract_strided_slice %70 {offsets = [40, 0], sizes = [8, 1], strides = [1, 1]} : vector<48x1xf32> to vector<8x1xf32>
    %161 = arith.mulf %158, %156 : vector<8x1xf32>
    %162 = arith.mulf %161, %155 : vector<8x1xf32>
    %163 = arith.mulf %159, %157 : vector<8x1xf32>
    %164 = arith.mulf %163, %154 : vector<8x1xf32>
    %165 = arith.subf %162, %164 : vector<8x1xf32>
    %166 = arith.mulf %158, %159 : vector<8x1xf32>
    %167 = arith.mulf %166, %160 : vector<8x1xf32>
    %168 = arith.addf %165, %167 : vector<8x1xf32>
    %169 = arith.mulf %73, %168 : vector<8x1xf32>
    %170 = tpu.concatenate %71, %89, %105, %121, %137, %153, %169 in 1 : vector<8x4xf32>, vector<8x1xf32>, vector<8x1xf32>, vector<8x1xf32>, vector<8x1xf32>, vector<8x1xf32>, vector<8x1xf32> -> vector<8x10xf32>
    %c0_29 = arith.constant 0 : index
    %c0_30 = arith.constant 0 : index
    %171 = vector.load %arg10[%c0_29, %c0_30] : memref<8x10xf32, #tpu.memory_space<vmem>>, vector<8x10xf32>
    tpu.vector_store %arg10[%c0_29, %c0_30], %170 {strides = array<i32>} : memref<8x10xf32, #tpu.memory_space<vmem>>, vector<8x10xf32>,
    return
  }
  func.func @transform_0(%arg0: i32) -> (i32, i32) {
    %c0_i32 = arith.constant 0 : i32
    %c0_i32_0 = arith.constant 0 : i32
    return %arg0, %c0_i32 : i32, i32
  }
  func.func @transform_1(%arg0: i32) -> (i32, i32) {
    %c0_i32 = arith.constant 0 : i32
    %c0_i32_0 = arith.constant 0 : i32
    return %arg0, %c0_i32 : i32, i32
  }
  func.func @transform_2(%arg0: i32) -> (i32, i32) {
    %c0_i32 = arith.constant 0 : i32
    %c0_i32_0 = arith.constant 0 : i32
    return %arg0, %c0_i32 : i32, i32
  }
  func.func @transform_3(%arg0: i32) -> (i32, i32) {
    %c0_i32 = arith.constant 0 : i32
    %c0_i32_0 = arith.constant 0 : i32
    %c0_i32_1 = arith.constant 0 : i32
    return %c0_i32, %c0_i32_0 : i32, i32
  }
  func.func @transform_4(%arg0: i32) -> (i32, i32) {
    %c0_i32 = arith.constant 0 : i32
    %c0_i32_0 = arith.constant 0 : i32
    %c0_i32_1 = arith.constant 0 : i32
    return %c0_i32, %c0_i32_0 : i32, i32
  }
  func.func @transform_5(%arg0: i32) -> (i32, i32) {
    %c0_i32 = arith.constant 0 : i32
    %c0_i32_0 = arith.constant 0 : i32
    %c0_i32_1 = arith.constant 0 : i32
    return %c0_i32, %c0_i32_0 : i32, i32
  }
  func.func @transform_6(%arg0: i32) -> (i32, i32) {
    %c0_i32 = arith.constant 0 : i32
    %c0_i32_0 = arith.constant 0 : i32
    %c0_i32_1 = arith.constant 0 : i32
    return %c0_i32, %c0_i32_0 : i32, i32
  }
  func.func @transform_7(%arg0: i32) -> (i32, i32) {
    %c0_i32 = arith.constant 0 : i32
    %c0_i32_0 = arith.constant 0 : i32
    %c0_i32_1 = arith.constant 0 : i32
    return %c0_i32, %c0_i32_0 : i32, i32
  }
  func.func @transform_8(%arg0: i32) -> (i32, i32) {
    %c0_i32 = arith.constant 0 : i32
    %c0_i32_0 = arith.constant 0 : i32
    %c0_i32_1 = arith.constant 0 : i32
    return %c0_i32, %c0_i32_0 : i32, i32
  }
  func.func @transform_9(%arg0: i32) -> (i32, i32) {
    %c0_i32 = arith.constant 0 : i32
    %c0_i32_0 = arith.constant 0 : i32
    return %arg0, %c0_i32 : i32, i32
  }
}

</mosaic_0001>

<bundles_post_ra>
// kernel: tpu_custom_call.1
= control target key start
LH: loop header
LB: loop body
LE: loop exit
PB: predicated region body
PF: predicated region fallthrough
CT: control target
= control target key end

     0   :  { %s1129_s0 = inlined_call_operand.vmem [shape: f32[8,4], index: 0, kind: input, shape index: {}]   ;;  %s1130_s1 = inlined_call_operand.vmem [shape: f32[8,32], index: 1, kind: input, shape index: {}]   ;;  %s1131_s2 = inlined_call_operand.vmem [shape: f32[8,5], index: 2, kind: input, shape index: {}]   ;;  %s1132_s3 = inlined_call_operand.vmem [shape: bf16[16,128], index: 3, kind: input, shape index: {}]   ;;  %s1133_s4 = inlined_call_operand.hbm [shape: f32[1,128], index: 4, kind: input, shape index: {}]   ;;  %s1134_s5 = inlined_call_operand.vmem [shape: bf16[128,128], index: 5, kind: input, shape index: {}]   ;;  %s1135_s6 = inlined_call_operand.hbm [shape: f32[1,128], index: 6, kind: input, shape index: {}]   ;;  %s1136_s7 = inlined_call_operand.vmem [shape: bf16[128,1], index: 7, kind: input, shape index: {}]   ;;  %s1137_s8 = inlined_call_operand.<no memory space> [shape: f32[1,1], index: 8, kind: input, shape index: {}]   ;;  %s1138_s9 = inlined_call_operand.hbm [shape: f32[8,10], index: 9, kind: output, shape index: {}]  }
   0x1   :  { %v14_v0 = vstv %s1137_s8 }
   0x2   :  { %15 = vst [vmem:[#allocation2] sm:$0x1] %v14_v0 }
   0x3   :  { %16 = vsyncpa [#allocation4], 0 }
   0x4   :  { %17 = vsyncpa [#allocation7], 0 }
   0x5   :  { %18 = vsyncpa [#allocation5], 0  ;;  %s885_s11 = smov [#allocation3]   ;;  %s886_s13 = smov [#allocation6]  }
   0x6   :  { %s33_s12 = sshll.u32 %s885_s11, 4  ;;  %s45_s14 = sshll.u32 %s886_s13, 4  ;;  %s34_s12 = int_to_ptr.vmem [resolvable:$true] %s33_s12  ;;  %s46_s14 = int_to_ptr.vmem [resolvable:$true] %s45_s14 }
   0x7   :  { %s827_s15 = scalar_lea.vmem %s34_s12, 16  ;;  %s831_s16 = scalar_lea.vmem %s34_s12, 32 }
   0x8   :  { %p828_p0 = scmp.ne.s32.totalorder %s34_s12, %s827_s15  ;;  %p832_p1 = scmp.lt.s32.totalorder %s34_s12, %s34_s12 }
   0x9   :  { %p833_p2 = scmp.lt.s32.totalorder %s831_s16, %s827_s15 }
   0xb   :  { %p834_p3 = por %p833_p2, %p832_p1 }
   0xd   :  { %p835_p4 = pnand %p834_p3, %p828_p0 }
   0xf   :  { %838 = shalt.err (!%p835_p4)
}
  0x10   :  { %36 = dma.hbm_to_vmem [thread:$0]  %s1133_s4, 16, %s34_s12, [#allocation4]  }
  0x11   :  { %s847_s18 = scalar_lea.vmem %s46_s14, 16  ;;  %s851_s19 = scalar_lea.vmem %s46_s14, 32 }
  0x12   :  { %p848_p5 = scmp.ne.s32.totalorder %s46_s14, %s847_s18  ;;  %p852_p6 = scmp.lt.s32.totalorder %s46_s14, %s46_s14 }
  0x13   :  { %p853_p7 = scmp.lt.s32.totalorder %s851_s19, %s847_s18 }
  0x15   :  { %p854_p8 = por %p853_p7, %p852_p6 }
  0x17   :  { %p855_p9 = pnand %p854_p8, %p848_p5 }
  0x19   :  { %858 = shalt.err (!%p855_p9)
}
  0x1a   :  { %48 = dma.hbm_to_vmem [thread:$0]  %s1135_s6, 16, %s46_s14, [#allocation7]  }
  0x1b   :  { %879 = dma.done.wait [#allocation4], 16  }
  0x1c   :  { %880 = vsyncadd [#allocation4], 4294967280 }
  0x1d   :  { %881 = dma.done.wait [#allocation7], 16  }
  0x1e   :  { %882 = vsyncadd [#allocation7], 4294967280  ;;  %v61_v1 = vlaneseq  ;;  %v887_v2 = vmov 0.0   ;;  %vm888_vm0 = vmmov 0   ;;  %v60_v5 = vld [vmem:[%s1130_s1] sm:$0xff]  ;;  %v889_v6 = vmov 1.0  }
  0x1f   :  { %713 = vmatprep.subr.bf16.mxu0 %v887_v2  ;;  %727 = vmatprep.subr.bf16.mxu1 %v887_v2  ;;  %v802_v8 = vld [vmem:[%s1132_s3] sm:$0xff]   ;;  %s890_s24 = smov 120   ;;  %s891_s25 = smov 112   ;;  %v803_v10 = vld [vmem:[%s1134_s5 + $0x38] sm:$0xff]   ;;  %v804_v11 = vld [vmem:[%s1134_s5 + $0x30] sm:$0xff]   ;;  %vm82_vm2 = vcmask 64512  }
  0x20   :  { %v62_v3 = vand.u32 127, %v61_v1  ;;  %715 = vmatprep.mubr.msk.bf16.mxu0 %vm888_vm0, %v887_v2  ;;  %743 = vmatprep.mubr.msk.bf16.mxu1 %vm888_vm0, %v887_v2  ;;  %v805_v12 = vld [vmem:[%s1134_s5 + $0x28] sm:$0xff]   ;;  %v806_v13 = vld [vmem:[%s1134_s5 + $0x20] sm:$0xff]   ;;  %v807_v14 = vld [vmem:[%s1134_s5 + $0x18] sm:$0xff]   ;;  %vm107_vm3 = vcmask 130048   ;;  %s892_s4 = smov 114  }
  0x21   :  { %714 = vmatpush3.bf16.msra.mxu0 %v802_v8  ;;  %728 = vmatpush3.bf16.msra.mxu1 %v803_v10  ;;  %v808_v23 = vld [vmem:[%s1134_s5 + $0x10] sm:$0xff]   ;;  %v809_v24 = vld [vmem:[%s1134_s5 + $0x8] sm:$0xff]   ;;  %v810_v25 = vld [vmem:[%s1134_s5] sm:$0xff]   ;;  %s893_s6 = smov 2   ;;  %s895_s23 = smov 107  }
  0x22   :  { %v67_v4 = vand.u32 7, %v62_v3  ;;  %755 = vmatprep.subr.bf16.mxu0 %v887_v2  ;;  %729 = vmatprep.subr.bf16.mxu1 %v887_v2  ;;  %v1026_v26 = vld [vmem:[%s1129_s0] sm:$0xff]  ;;  %v811_v27 = vld [vmem:[%s1136_s7 + $0x38] sm:$0xff]   ;;  %v812_v28 = vld [vmem:[%s1136_s7 + $0x30] sm:$0xff]   ;;  %s894_s0 = smov 1   ;;  %s896_s26 = smov 3  }
  0x23   :  { %v813_v29 = vld [vmem:[%s1136_s7 + $0x28] sm:$0xff]   ;;  %v814_v30 = vld [vmem:[%s1136_s7 + $0x20] sm:$0xff]   ;;  %s897_s28 = smov 121   ;;  %v815_v31 = vld [vmem:[%s1136_s7 + $0x18] sm:$0xff]   ;;  %s898_s17 = smov 126  }
  0x24   :  { %vm75_vm1 = vcmp.eq.s32.totalorder %v67_v4, 0  ;;  %v664_v32 = vld [vmem:[#allocation3] ss:$0 sm:$0xff]  ;;  %v816_v3 = vld [vmem:[%s1136_s7 + $0x10] sm:$0xff]   ;;  %v817_v4 = vld [vmem:[%s1136_s7 + $0x8] sm:$0xff]   ;;  %s899_s8 = smov 125  }
  0x25   :  { %v76_v7 = vsel %vm75_vm1, 0.28867513, %v889_v6  ;;  %730 = vmatpush3.bf16.msra.mxu1 %v804_v11  ;;  %v1075_v6 = vld [vmem:[%s1131_s2] sm:$0xff]  ;;  %s900_s2 = smov 127   ;;  %s902_s18 = smov 5   ;;  %vm637_vm1 = vcmask 39936  }
  0x26   :  { %v975_v9 = vmul.f32 %v76_v7, %v60_v5  ;;  %731 = vmatprep.subr.bf16.mxu1 %v887_v2  ;;  %v818_v5 = vld [vmem:[%s1136_s7] sm:$0xff]   ;;  %s901_s7 = smov 4   ;;  %s903_s19 = smov [#allocation8]  }
  0x27   :  { %s654_s20 = sshll.u32 %s903_s19, 4  ;;  %s655_s20 = int_to_ptr.vmem [resolvable:$true] %s654_s20 }
  0x28   :  { %79 = vrot.lane.b32.xlu0 %v975_v9, %s890_s24  ;;  %509 = vrot.lane.b32.xlu1 %v975_v9, %s892_s4  ;;  %s859_s21 = scalar_lea.vmem %s655_s20, 128  ;;  %p864_p11 = scmp.lt.s32.totalorder %s655_s20, %s655_s20 }
  0x29   :  { %732 = vmatpush3.bf16.msra.mxu1 %v805_v12  ;;  %p860_p10 = scmp.ne.s32.totalorder %s655_s20, %s859_s21  ;;  %p865_p12 = scmp.lt.s32.totalorder %s859_s21, %s859_s21 }
  0x2a   :  { %733 = vmatprep.subr.bf16.mxu1 %v887_v2 }
  0x2b   :  { %p866_p13 = por %p865_p12, %p864_p11 }
  0x2c   :  { %84 = vrot.lane.b32.xlu0 %v975_v9, %s891_s25  ;;  %537 = vrot.lane.b32.xlu1 %v975_v9, %s895_s23 }
  0x2d   :  { %734 = vmatpush3.bf16.msra.mxu1 %v806_v13  ;;  %p867_p0 = pnand %p866_p13, %p860_p10 }
  0x2e   :  { %735 = vmatprep.subr.bf16.mxu1 %v887_v2 }
  0x30   :  { %513 = vrot.lane.b32.xlu0 %v1026_v26, %s893_s6  ;;  %541 = vrot.lane.b32.xlu1 %v1026_v26, %s896_s26 }
  0x31   :  { %736 = vmatpush3.bf16.msra.mxu1 %v807_v14 }
  0x32   :  { %737 = vmatprep.subr.bf16.mxu1 %v887_v2 }
  0x34   :  { %484 = vrot.lane.b32.xlu0 %v1026_v26, %s894_s0  ;;  %480 = vrot.lane.b32.xlu1 %v975_v9, %s897_s28 }
  0x35   :  { %738 = vmatpush3.bf16.msra.mxu1 %v808_v23  ;;  %v669_v23 = vld [vmem:[#allocation6] ss:$0 sm:$0xff] }
  0x36   :  { %739 = vmatprep.subr.bf16.mxu1 %v887_v2 }
  0x38   :  { %505 = vrot.lane.b32.xlu0 %v1026_v26, %s898_s17  ;;  %522 = vrot.lane.b32.xlu1 %v1075_v6, %s898_s17 }
  0x39   :  { %740 = vmatpush3.bf16.msra.mxu1 %v809_v24 }
  0x3a   :  { %741 = vmatprep.subr.bf16.mxu1 %v887_v2 }
  0x3c   :  { %533 = vrot.lane.b32.xlu0 %v1026_v26, %s899_s8  ;;  %550 = vrot.lane.b32.xlu1 %v1075_v6, %s899_s8 }
  0x3d   :  { %742 = vmatpush3.bf16.msra.mxu1 %v810_v25 }
  0x40   :  { %476 = vrot.lane.b32.xlu0 %v1026_v26, %s900_s2  ;;  %494 = vrot.lane.b32.xlu1 %v1075_v6, %s900_s2 }
  0x9a   :  { %v80_v15 = vpop.permute.xlu0 %79  ;;  %v510_v7 = vpop.permute.xlu1 %509 }
  0x9b   :  { %v83_v16 = vsel %vm82_vm2, %v975_v9, %v80_v15  ;;  %v1081_v11 = vmul.f32 %v510_v7, %v1075_v6  ;;  %v678_v7 = vld [vmem:[#allocation2] ss:$0 sm:$0xff] }
  0x9c   :  { %v89_v17 = vpack.c.bf16 %v83_v16, %v975_v9 }
  0x9e   :  { %716 = vmatmul.mubr.msk.bf16.vlgmr.msra.gmra.mxu0 %vm107_vm3, %v89_v17  ;;  %v85_v18 = vpop.permute.xlu0 %84  ;;  %v538_v10 = vpop.permute.xlu1 %537 }
  0x9f   :  { %719 = vmatprep.mubr.msk.bf16.mxu0 %vm888_vm0, %v887_v2  ;;  %v87_v19 = vsel %vm82_vm2, %v975_v9, %v85_v18  ;;  %v88_v21 = vsel %vm82_vm2, %v80_v15, %v85_v18  ;;  %756 = vmatpush3.bf16.msra.mxu0 %v811_v27  ;;  %v540_v12 = vmul.f32 %v538_v10, %v1075_v6 }
  0xa0   :  { %v90_v20 = vpack.c.bf16 %v80_v15, %v87_v19  ;;  %v91_v22 = vpack.c.bf16 %v85_v18, %v88_v21  ;;  %757 = vmatprep.subr.bf16.mxu0 %v887_v2 }
  0xa2   :  { %v514_v8 = vpop.permute.xlu0 %513  ;;  %v542_v13 = vpop.permute.xlu1 %541 }
  0xa3   :  { %758 = vmatpush3.bf16.msra.mxu0 %v812_v28  ;;  %v516_v14 = vmul.f32 %v514_v8, %v1081_v11  ;;  %v544_v15 = vmul.f32 %v542_v13, %v540_v12  ;;  %v580_v18 = vmul.f32 %v540_v12, %v514_v8 }
  0xa4   :  { %759 = vmatprep.subr.bf16.mxu0 %v887_v2 }
  0xa5   :  { %518 = vrot.lane.b32.xlu0 %v516_v14, %s898_s17  ;;  %546 = vrot.lane.b32.xlu1 %v544_v15, %s899_s8 }
  0xa6   :  { %720 = vmatmul.mubr.msk.bf16.gmra.mxu0 %vm107_vm3, %v90_v20  ;;  %v485_v16 = vpop.permute.xlu0 %484  ;;  %v481_v19 = vpop.permute.xlu1 %480 }
  0xa7   :  { %723 = vmatprep.mubr.msk.bf16.mxu0 %vm888_vm0, %v887_v2  ;;  %760 = vmatpush3.bf16.msra.mxu0 %v813_v29  ;;  %v562_v17 = vmul.f32 %v1081_v11, %v485_v16  ;;  %v1090_v20 = vmul.f32 %v481_v19, %v1075_v6  ;;  %v598_v21 = vmul.f32 %v540_v12, %v485_v16 }
  0xa8   :  { %761 = vmatprep.subr.bf16.mxu0 %v887_v2 }
  0xa9   :  { %564 = vrot.lane.b32.xlu0 %v562_v17, %s900_s2 }
  0xab   :  { %762 = vmatpush3.bf16.msra.mxu0 %v814_v30 }
  0xac   :  { %763 = vmatprep.subr.bf16.mxu0 %v887_v2 }
  0xad   :  { %582 = vrot.lane.b32.xlu0 %v580_v18, %s898_s17 }
  0xae   :  { %724 = vmatmul.mubr.msk.bf16.gmra.mxu0 %vm107_vm3, %v91_v22  ;;  %v487_v22 = vmul.f32 %v485_v16, %v1090_v20  ;;  %vm639_vm3 = vcmask 48128  }
  0xaf   :  { %771 = vmatprep.mubr.msk.bf16.mxu0 %vm888_vm0, %v887_v2  ;;  %764 = vmatpush3.bf16.msra.mxu0 %v815_v31 }
  0xb0   :  { %765 = vmatprep.subr.bf16.mxu0 %v887_v2 }
  0xb1   :  { %600 = vrot.lane.b32.xlu0 %v598_v21, %s900_s2 }
  0xb3   :  { %766 = vmatpush3.bf16.msra.mxu0 %v816_v3 }
  0xb4   :  { %767 = vmatprep.subr.bf16.mxu0 %v887_v2 }
  0xb5   :  { %489 = vrot.lane.b32.xlu0 %v487_v22, %s900_s2 }
  0xb7   :  { %768 = vmatpush3.bf16.msra.mxu0 %v817_v4 }
  0xb8   :  { %769 = vmatprep.subr.bf16.mxu0 %v887_v2 }
  0xbb   :  { %770 = vmatpush3.bf16.msra.mxu0 %v818_v5 }
 0x15e   :  { %v151_v33 = vpop.f32.mrf.mxu0 }
 0x15f   :  { %v152_v34 = vadd.f32 %v664_v32, %v151_v33 }
 0x160   :  { %v717_v35 = vpop.f32.mrf.mxu0 }
 0x161   :  { %v180_v37 = vmul.f32 0.01, %v152_v34  ;;  %vm174_vm4 = vcmp.gt.f32.partialorder %v152_v34, 0.0 }
 0x162   :  { %v154_v36 = vpop.f32.mrf.mxu0 }
 0x163   :  { %v155_v38 = vadd.f32 %v664_v32, %v154_v36  ;;  %v186_v43 = vsel %vm174_vm4, %v152_v34, %v180_v37  ;;  %vm641_vm4 = vcmask 56320  }
 0x164   :  { %v718_v39 = vpop.f32.mrf.mxu0 }
 0x165   :  { %vm175_vm5 = vcmp.gt.f32.partialorder %v155_v38, 0.0  ;;  %v181_v40 = vmul.f32 0.01, %v155_v38 }
 0x166   :  { %v159_v41 = vpop.f32.mrf.mxu0 }
 0x167   :  { %v160_v42 = vadd.f32 %v664_v32, %v159_v41  ;;  %v187_v44 = vsel %vm175_vm5, %v155_v38, %v181_v40  ;;  %vm644_vm5 = vcmask 72704  }
 0x168   :  { %v721_v45 = vpop.f32.mrf.mxu0  ;;  %v192_v46 = vpack.c.bf16 %v187_v44, %v186_v43 }
 0x169   :  { %v182_v48 = vmul.f32 0.01, %v160_v42  ;;  %vm176_vm6 = vcmp.gt.f32.partialorder %v160_v42, 0.0 }
 0x16a   :  { %v162_v47 = vpop.f32.mrf.mxu0  ;;  %744 = vmatmul.mubr.bf16.vlgmr.msra.gmra.mxu1 %v192_v46 }
 0x16b   :  { %v163_v49 = vadd.f32 %v664_v32, %v162_v47  ;;  %747 = vmatprep.mubr.msk.bf16.mxu1 %vm888_vm0, %v887_v2  ;;  %v188_v54 = vsel %vm176_vm6, %v160_v42, %v182_v48  ;;  %vm646_vm6 = vcmask 80896  }
 0x16c   :  { %v722_v50 = vpop.f32.mrf.mxu0 }
 0x16d   :  { %vm177_vm7 = vcmp.gt.f32.partialorder %v163_v49, 0.0  ;;  %v183_v51 = vmul.f32 0.01, %v163_v49 }
 0x16e   :  { %v167_v52 = vpop.f32.mrf.mxu0 }
 0x16f   :  { %v168_v53 = vadd.f32 %v664_v32, %v167_v52  ;;  %v189_v55 = vsel %vm177_vm7, %v163_v49, %v183_v51 }
 0x170   :  { %v725_v56 = vpop.f32.mrf.mxu0  ;;  %v193_v57 = vpack.c.bf16 %v189_v55, %v188_v54 }
 0x171   :  { %v184_v59 = vmul.f32 0.01, %v168_v53  ;;  %vm178_vm8 = vcmp.gt.f32.partialorder %v168_v53, 0.0 }
 0x172   :  { %v170_v58 = vpop.f32.mrf.mxu0  ;;  %748 = vmatmul.mubr.bf16.gmra.mxu1 %v193_v57 }
 0x173   :  { %v171_v60 = vadd.f32 %v664_v32, %v170_v58  ;;  %751 = vmatprep.mubr.msk.bf16.mxu1 %vm888_vm0, %v887_v2  ;;  %v190_v63 = vsel %vm178_vm8, %v168_v53, %v184_v59  ;;  %v506_v58 = vpop.permute.xlu0 %505 }
 0x174   :  { %v726_v61 = vpop.f32.mrf.mxu0 }
 0x175   :  { %vm179_vm9 = vcmp.gt.f32.partialorder %v171_v60, 0.0  ;;  %v185_v62 = vmul.f32 0.01, %v171_v60 }
 0x177   :  { %v191_v0 = vsel %vm179_vm9, %v171_v60, %v185_v62  ;;  %v534_v59 = vpop.permute.xlu0 %533  ;;  %v474_v60 = vmul.f32 %v1075_v6, %v975_v9 }
 0x178   :  { %v194_v1 = vpack.c.bf16 %v191_v0, %v190_v63 }
 0x179   :  { %v536_v9 = vmul.f32 %v534_v59, %v474_v60 }
 0x17a   :  { %752 = vmatmul.mubr.bf16.gmra.mxu1 %v194_v1  ;;  %v523_v1 = vpop.permute.xlu1 %522 }
 0x17b   :  { %v477_v61 = vpop.permute.xlu0 %476 }
 0x17c   :  { %v479_v62 = vmul.f32 %v477_v61, %v474_v60 }
 0x17f   :  { %v519_v63 = vpop.permute.xlu0 %518 }
 0x183   :  { %v565_v0 = vpop.permute.xlu0 %564 }
 0x187   :  { %v583_v3 = vpop.permute.xlu0 %582 }
 0x18b   :  { %v601_v4 = vpop.permute.xlu0 %600 }
 0x18f   :  { %v490_v8 = vpop.permute.xlu0 %489 }
 0x190   :  { %v492_v14 = vsub.f32 %v479_v62, %v490_v8 }
 0x22a   :  { %v300_v24 = vpop.f32.mrf.mxu1 }
 0x22b   :  { %v301_v25 = vadd.f32 %v669_v23, %v300_v24 }
 0x22c   :  { %v745_v27 = vpop.f32.mrf.mxu1 }
 0x22d   :  { %v329_v29 = vmul.f32 0.01, %v301_v25  ;;  %vm323_vm10 = vcmp.gt.f32.partialorder %v301_v25, 0.0 }
 0x22e   :  { %v303_v28 = vpop.f32.mrf.mxu1 }
 0x22f   :  { %v304_v30 = vadd.f32 %v669_v23, %v303_v28  ;;  %v335_v34 = vsel %vm323_vm10, %v301_v25, %v329_v29 }
 0x230   :  { %v746_v31 = vpop.f32.mrf.mxu1 }
 0x231   :  { %vm324_vm11 = vcmp.gt.f32.partialorder %v304_v30, 0.0  ;;  %v330_v32 = vmul.f32 0.01, %v304_v30 }
 0x232   :  { %v308_v33 = vpop.f32.mrf.mxu1 }
 0x233   :  { %v336_v35 = vsel %vm324_vm11, %v304_v30, %v330_v32  ;;  %v309_v36 = vadd.f32 %v669_v23, %v308_v33 }
 0x234   :  { %v341_v37 = vpack.c.bf16 %v336_v35, %v335_v34  ;;  %v749_v38 = vpop.f32.mrf.mxu1  ;;  %v508_v34 = vmul.f32 %v506_v58, %v474_v60  ;;  %v525_v35 = vmul.f32 %v523_v1, %v1075_v6 }
 0x235   :  { %v331_v40 = vmul.f32 0.01, %v309_v36  ;;  %vm325_vm12 = vcmp.gt.f32.partialorder %v309_v36, 0.0 }
 0x236   :  { %v311_v39 = vpop.f32.mrf.mxu1  ;;  %772 = vmatmul.mubr.bf16.vlgmr.msra.gmra.mxu0 %v341_v37 }
 0x237   :  { %v312_v41 = vadd.f32 %v669_v23, %v311_v39  ;;  %775 = vmatprep.mubr.msk.bf16.mxu0 %vm888_vm0, %v887_v2  ;;  %v337_v46 = vsel %vm325_vm12, %v309_v36, %v331_v40  ;;  %v521_v40 = vsub.f32 %v508_v34, %v519_v63 }
 0x238   :  { %v750_v42 = vpop.f32.mrf.mxu1 }
 0x239   :  { %vm326_vm13 = vcmp.gt.f32.partialorder %v312_v41, 0.0  ;;  %v332_v43 = vmul.f32 0.01, %v312_v41 }
 0x23a   :  { %v316_v44 = vpop.f32.mrf.mxu1 }
 0x23b   :  { %v317_v45 = vadd.f32 %v669_v23, %v316_v44  ;;  %v338_v47 = vsel %vm326_vm13, %v312_v41, %v332_v43 }
 0x23c   :  { %v753_v48 = vpop.f32.mrf.mxu1  ;;  %v342_v49 = vpack.c.bf16 %v338_v47, %v337_v46  ;;  %v579_v47 = vmul.f32 %v506_v58, %v1090_v20 }
 0x23d   :  { %v333_v51 = vmul.f32 0.01, %v317_v45  ;;  %vm327_vm14 = vcmp.gt.f32.partialorder %v317_v45, 0.0 }
 0x23e   :  { %v319_v50 = vpop.f32.mrf.mxu1  ;;  %776 = vmatmul.mubr.bf16.gmra.mxu0 %v342_v49 }
 0x23f   :  { %v320_v52 = vadd.f32 %v669_v23, %v319_v50  ;;  %779 = vmatprep.mubr.msk.bf16.mxu0 %vm888_vm0, %v887_v2  ;;  %v339_v55 = vsel %vm327_vm14, %v317_v45, %v333_v51  ;;  %v551_v2 = vpop.permute.xlu1 %550  ;;  %v561_v45 = vmul.f32 %v1090_v20, %v477_v61  ;;  %vm635_vm0 = vcmask 31744  }
 0x240   :  { %v754_v53 = vpop.f32.mrf.mxu1  ;;  %v553_v22 = vmul.f32 %v551_v2, %v1075_v6 }
 0x241   :  { %vm328_vm15 = vcmp.gt.f32.partialorder %v320_v52, 0.0  ;;  %v334_v54 = vmul.f32 0.01, %v320_v52  ;;  %v567_v48 = vsub.f32 %v561_v45, %v565_v0  ;;  %v597_v53 = vmul.f32 %v1081_v11, %v477_v61 }
 0x243   :  { %v340_v56 = vsel %vm328_vm15, %v320_v52, %v334_v54  ;;  %v495_v5 = vpop.permute.xlu1 %494  ;;  %v585_v52 = vsub.f32 %v579_v47, %v583_v3 }
 0x244   :  { %v343_v57 = vpack.c.bf16 %v340_v56, %v339_v55  ;;  %v497_v10 = vmul.f32 %v495_v5, %v1075_v6 }
 0x246   :  { %780 = vmatmul.mubr.bf16.gmra.mxu0 %v343_v57  ;;  %v603_v57 = vsub.f32 %v597_v53, %v601_v4 }
 0x247   :  { %v547_v21 = vpop.permute.xlu1 %546 }
 0x248   :  { %v549_v25 = vsub.f32 %v536_v9, %v547_v21 }
 0x2f6   :  { %v449_v12 = vpop.f32.mrf.mxu0 }
 0x2f7   :  { %v450_v13 = vadd.f32 %v678_v7, %v449_v12 }
 0x2f8   :  { %v773_v15 = vpop.f32.mrf.mxu0 }
 0x2f9   :  { %v498_v16 = vmul.f32 %v497_v10, %v450_v13 }
 0x2fa   :  { %v452_v17 = vpop.f32.mrf.mxu0 }
 0x2fb   :  { %v499_v18 = vadd.f32 %v498_v16, %v492_v14  ;;  %v453_v36 = vadd.f32 %v678_v7, %v452_v17 }
 0x2fc   :  { %v774_v19 = vpop.f32.mrf.mxu0 }
 0x2fd   :  { %v526_v41 = vmul.f32 %v525_v35, %v453_v36 }
 0x2fe   :  { %v457_v23 = vpop.f32.mrf.mxu0 }
 0x2ff   :  { %v458_v24 = vadd.f32 %v678_v7, %v457_v23  ;;  %v527_v44 = vadd.f32 %v526_v41, %v521_v40 }
 0x300   :  { %v777_v27 = vpop.f32.mrf.mxu0 }
 0x301   :  { %v554_v28 = vmul.f32 %v553_v22, %v458_v24 }
 0x302   :  { %v460_v29 = vpop.f32.mrf.mxu0 }
 0x303   :  { %v555_v30 = vadd.f32 %v554_v28, %v549_v25  ;;  %v461_v31 = vadd.f32 %v678_v7, %v460_v29 }
 0x304   :  { %v778_v32 = vpop.f32.mrf.mxu0 }
 0x305   :  { %569 = vrot.lane.b32.xlu1 %v461_v31, %s894_s0  ;;  %557 = vrot.lane.b32.xlu0 %v555_v30, %s901_s7 }
 0x306   :  { %v465_v33 = vpop.f32.mrf.mxu0 }
 0x307   :  { %v466_v37 = vadd.f32 %v678_v7, %v465_v33 }
 0x308   :  { %v781_v38 = vpop.f32.mrf.mxu0 }
 0x309   :  { %587 = vrot.lane.b32.xlu1 %v466_v37, %s894_s0 }
 0x30a   :  { %v468_v39 = vpop.f32.mrf.mxu0 }
 0x30b   :  { %v469_v42 = vadd.f32 %v678_v7, %v468_v39 }
 0x30c   :  { %v782_v43 = vpop.f32.mrf.mxu0 }
 0x30d   :  { %605 = vrot.lane.b32.xlu1 %v469_v42, %s893_s6 }
 0x311   :  { %529 = vrot.lane.b32.xlu1 %v527_v44, %s901_s7 }
 0x377   :  { %v570_v46 = vpop.permute.xlu1 %569  ;;  %v558_v62 = vpop.permute.xlu0 %557 }
 0x378   :  { %v572_v49 = vmul.f32 %v570_v46, %v497_v10  ;;  %v560_v20 = vmul.f32 %v558_v62, %v1075_v6 }
 0x37a   :  { %v573_v50 = vadd.f32 %v572_v49, %v567_v48 }
 0x37b   :  { %v588_v51 = vpop.permute.xlu1 %587 }
 0x37c   :  { %v590_v54 = vmul.f32 %v588_v51, %v525_v35  ;;  %575 = vrot.lane.b32.xlu1 %v573_v50, %s896_s26 }
 0x37e   :  { %v591_v55 = vadd.f32 %v590_v54, %v585_v52 }
 0x37f   :  { %v606_v56 = vpop.permute.xlu1 %605 }
 0x380   :  { %v608_v59 = vmul.f32 %v606_v56, %v497_v10  ;;  %593 = vrot.lane.b32.xlu0 %v591_v55, %s896_s26 }
 0x382   :  { %v609_v60 = vadd.f32 %v608_v59, %v603_v57 }
 0x383   :  { %v530_v63 = vpop.permute.xlu1 %529 }
 0x384   :  { %611 = vrot.lane.b32.xlu1 %v609_v60, %s893_s6  ;;  %501 = vrot.lane.b32.xlu0 %v499_v18, %s901_s7  ;;  %v532_v11 = vmul.f32 %v530_v63, %v1075_v6 }
 0x388   :  { %616 = vrot.lane.b32.xlu1 %v532_v11, %s894_s0  ;;  %620 = vrot.lane.b32.xlu0 %v560_v20, %s893_s6 }
 0x3ee   :  { %v576_v58 = vpop.permute.xlu1 %575 }
 0x3ef   :  { %v578_v61 = vmul.f32 %v576_v58, %v1075_v6 }
 0x3f1   :  { %624 = vrot.lane.b32.xlu1 %v578_v61, %s896_s26 }
 0x3f2   :  { %v594_v0 = vpop.permute.xlu0 %593 }
 0x3f3   :  { %v596_v1 = vmul.f32 %v594_v0, %v1075_v6 }
 0x3f5   :  { %628 = vrot.lane.b32.xlu0 %v596_v1, %s901_s7 }
 0x3f6   :  { %v612_v3 = vpop.permute.xlu1 %611  ;;  %v502_v4 = vpop.permute.xlu0 %501 }
 0x3f7   :  { %v614_v2 = vmul.f32 %v612_v3, %v1075_v6  ;;  %v504_v5 = vmul.f32 %v502_v4, %v1075_v6 }
 0x3f9   :  { %632 = vrot.lane.b32.xlu1 %v614_v2, %s902_s18  ;;  %v636_v8 = vsel %vm635_vm0, %v1026_v26, %v504_v5 }
 0x3fa   :  { %v617_v7 = vpop.permute.xlu1 %616  ;;  %v621_v10 = vpop.permute.xlu0 %620 }
 0x3fb   :  { %v638_v12 = vsel %vm637_vm1, %v636_v8, %v617_v7 }
 0x3fc   :  { %v640_v15 = vsel %vm639_vm3, %v638_v12, %v621_v10 }
 0x463   :  { %v625_v13 = vpop.permute.xlu1 %624 }
 0x464   :  { %v642_v16 = vsel %vm641_vm4, %v640_v15, %v625_v13 }
 0x467   :  { %v629_v14 = vpop.permute.xlu0 %628 }
 0x468   :  { %v643_v17 = vsel %vm82_vm2, %v642_v16, %v629_v14 }
 0x46b   :  { %v633_v6 = vpop.permute.xlu1 %632 }
 0x46c   :  { %v645_v9 = vsel %vm644_vm5, %v643_v17, %v633_v6 }
 0x46d   :  { %647 = vst.msk [vmem:[#allocation8] sm:$0xff] %vm646_vm6, %v645_v9 }
 0x46e   :  { %870 = shalt.err (!%p867_p0)
}
 0x46f   :  { %657 = dma.vmem_to_hbm [thread:$0]  %s655_s20, 128, %s1138_s9, [#allocation5]  }
 0x470   :  { %883 = dma.done.wait [#allocation5], 128  }
 0x471   :  { %884 = vsyncadd [#allocation5], 4294967168 }
 0x472   :  { %661 = vsyncpa [#allocation4], 1 }
 0x473   :  { %662 = vsyncpa [#allocation7], 1 }
 0x474   :  { %663 = vsyncpa [#allocation5], 1 }

</bundles_post_ra>
